<compile_context>
chip_gen: v7x
topology: tpu7x:2x2x1
jax: 0.10.0
libtpu: 0.0.40
codegen_flags: <defaults>
</compile_context>

<pallas_src>
import functools

import jax
import jax.numpy as jnp
from jax.experimental import pallas as pl
from jax.experimental.pallas import tpu as pltpu

_LANES = 128
_SUBLANES = 8
_TARGET_BLOCK_BYTES = 8 * 1024 * 1024   # per input block (lane-padded)
_VMEM_LIMIT_BYTES = 32 * 1024 * 1024    # safe on v5e/v6e/v7x


def _round_up(a: int, b: int) -> int:
    return (a + b - 1) // b * b


def _round_down(a: int, b: int) -> int:
    return a // b * b


def _finalize_rowmax(m, o_ref, *, p, apply_pow):
    # m: (tr,) per-row maxima.  pow is applied to this tiny reduced result only.
    if apply_pow:
        mf = m.astype(jnp.float32)
        m = (mf ** p) ** (1.0 / p)
    # Lane-dense store: (tr,) -> (1, 1, tr) full-extent output block.
    o_ref[...] = m.reshape(1, 1, -1).astype(o_ref.dtype)


def _gmp_single_pass_kernel(x_ref, o_ref, *, p, use_abs, apply_pow):
    # x_ref: (tr, hw) -- the spatial axis is the full extent, so no OOB lanes exist.
    x = x_ref[...]
    if use_abs:
        x = jnp.abs(x)   # even integer p: max(x^p) == max(|x|)^p
    # Compiler lowers this as a VPU fold across lane-chunks + one XLU cross-lane
    # reduce per 8 rows -- fully hidden under the HBM DMA for H*W >= ~128.
    m = jnp.max(x, axis=-1)                       # (tr,)
    _finalize_rowmax(m, o_ref, p=p, apply_pow=apply_pow)


def _gmp_tiled_kernel(x_ref, o_ref, acc_ref, *, p, hw, ts, use_abs, apply_pow,
                      init_val, needs_mask):
    # Rare path: H*W too large for one block.  acc_ref is a tiny (tr, 1) running max.
    j = pl.program_id(1)

    @pl.when(j == 0)
    def _init():
        acc_ref[...] = jnp.full(acc_ref.shape, init_val, acc_ref.dtype)

    x = x_ref[...]                                # (tr, ts)
    if use_abs:
        x = jnp.abs(x)
    if needs_mask:
        # Ragged lane tail handled in-kernel (no wrapper-side pad): OOB columns of the
        # last spatial block are replaced with the max-identity.
        col = j * ts + jax.lax.broadcasted_iota(jnp.int32, x.shape, 1)
        x = jnp.where(col < hw, x, jnp.full_like(x, init_val))

    m = jnp.max(x, axis=-1, keepdims=True)        # (tr, 1), one XLU finish per tile
    acc_ref[...] = jnp.maximum(acc_ref[...], m)

    @pl.when(j == pl.num_programs(1) - 1)
    def _fin():
        _finalize_rowmax(acc_ref[:, 0], o_ref, p=p, apply_pow=apply_pow)


def global_max_pool2d(x: jax.Array, p: float = 1.0) -> jax.Array:
    """Pallas equivalent of GlobalMaxPool2d(p).forward(x) for NCHW input."""
    p = float(p)
    assert p != 0, "p == 0 divides by zero in 1/p"
    assert p > 0, "monotone pow-hoist assumes p > 0"
    # TODO(synk): for non-integer p the pow is hoisted past the max; exact only for
    # x >= 0 (typical post-ReLU use); the PyTorch reference is NaN there anyway.

    N, C, H, W = x.shape
    rows, hw = N * C, H * W
    x2 = x.reshape(rows, hw)            # free view: NCHW is contiguous
    itemsize = x2.dtype.itemsize

    p_is_int = p == int(p)
    use_abs = p_is_int and int(p) % 2 == 0     # even integer p
    apply_pow = p != 1.0

    if jnp.issubdtype(x2.dtype, jnp.floating):
        init_val = float("-inf")
    else:
        init_val = int(jnp.iinfo(x2.dtype).min)
        # TODO(synk): even-integer p with signed-int inputs can overflow abs(INT_MIN).

    hw_pad = _round_up(hw, _LANES)               # lane-padded VMEM footprint per row
    min_tr = rows if rows < _SUBLANES else _SUBLANES
    single_pass = min_tr * hw_pad * itemsize <= _TARGET_BLOCK_BYTES

    if single_pass:
        # One full-extent spatial block per row tile: contiguous HBM reads, no
        # accumulator, no masking.
        ts = hw
        tr = _round_down(_TARGET_BLOCK_BYTES // (hw_pad * itemsize), _SUBLANES)
        tr = max(tr, _SUBLANES)
        tr = min(tr, _round_up(rows, _SUBLANES))
        if tr >= rows:
            tr = rows                            # full extent along rows (always legal)
        # v7x has 2 TensorCores: make sure the "parallel" row axis has >= 2 tiles
        # whenever there is enough work to split.  Harmless on v5e/v6e.
        if rows >= 2 * _SUBLANES and pl.cdiv(rows, tr) < 2:
            tr = _round_up(pl.cdiv(rows, 2), _SUBLANES)
        n_row = pl.cdiv(rows, tr)

        kernel = functools.partial(_gmp_single_pass_kernel,
                                   p=p, use_abs=use_abs, apply_pow=apply_pow)
        grid = (n_row,)
        in_specs = [pl.BlockSpec((tr, ts), lambda i: (i, 0))]
        out_specs = pl.BlockSpec((1, 1, tr), lambda i: (i, 0, 0))
        scratch_shapes = []
        dim_sem = ("parallel",)
    else:
        # Huge H*W: tile the spatial axis in 128-lane multiples, reduce-axis last.
        tr = min(128, _round_up(rows, _SUBLANES))
        if tr >= rows:
            tr = rows
        ts = _round_down(_TARGET_BLOCK_BYTES // (max(tr, 1) * itemsize), _LANES)
        ts = max(_LANES, min(ts, _round_up(hw, _LANES)))
        needs_mask = (hw % ts) != 0
        n_row = pl.cdiv(rows, tr)
        n_sp = pl.cdiv(hw, ts)

        kernel = functools.partial(_gmp_tiled_kernel,
                                   p=p, hw=hw, ts=ts, use_abs=use_abs,
                                   apply_pow=apply_pow, init_val=init_val,
                                   needs_mask=needs_mask)
        grid = (n_row, n_sp)
        in_specs = [pl.BlockSpec((tr, ts), lambda i, j: (i, j))]
        out_specs = pl.BlockSpec((1, 1, tr), lambda i, j: (i, 0, 0))
        scratch_shapes = [pltpu.VMEM((tr, 1), x2.dtype)]
        dim_sem = ("parallel", "arbitrary")

    out = pl.pallas_call(
        kernel,
        out_shape=jax.ShapeDtypeStruct((n_row, 1, tr), x2.dtype),
        grid=grid,
        in_specs=in_specs,
        out_specs=out_specs,
        scratch_shapes=scratch_shapes,
        compiler_params=pltpu.CompilerParams(
            dimension_semantics=dim_sem,
            vmem_limit_bytes=_VMEM_LIMIT_BYTES,
        ),
    )(x2)

    # Lane-dense (n_row, 1, tr) result -> (rows,) -> (N, C, 1, 1); garbage entries
    # from the ragged row tail (if any) are sliced off here.
    return out.reshape(n_row * tr)[:rows].reshape(N, C, 1, 1)


def _reference(x: jnp.ndarray, p: float = 1.0) -> jnp.ndarray:
    out = x ** p
    out = jnp.max(out, axis=(-2, -1), keepdims=True)
    return out ** (1.0 / p)


if __name__ == "__main__":
    key = jax.random.PRNGKey(0)
    N, C, H, W = 2, 4, 16, 16
    x = jax.random.normal(key, (N, C, H, W), dtype=jnp.float32)

    # Module default: p=1 (plain global max pooling). No learnable parameters.
    out = jax.block_until_ready(global_max_pool2d(x, p=1.0))
    ref = _reference(x, 1.0)
    assert out.shape == (N, C, 1, 1), out.shape
    assert jnp.allclose(out, ref, atol=1e-6, rtol=1e-6), "mismatch vs reference (p=1)"

    # Even integer p (abs path): valid with negative inputs.
    out2 = jax.block_until_ready(global_max_pool2d(x, p=2.0))
    ref2 = _reference(x, 2.0)
    assert jnp.allclose(out2, ref2, atol=1e-5, rtol=1e-5), "mismatch vs reference (p=2)"

    # Non-even p on non-negative data (post-ReLU-style), exercising the pow hoist.
    x_pos = jnp.abs(x)
    out3 = jax.block_until_ready(global_max_pool2d(x_pos, p=3.0))
    ref3 = _reference(x_pos, 3.0)
    assert jnp.allclose(out3, ref3, atol=1e-5, rtol=1e-5), "mismatch vs reference (p=3)"

    # Ragged shape (rows=15 not a multiple of 8, H*W=49 not a multiple of 128):
    # exercises the pad-free / full-extent-block path.
    y = jax.random.normal(jax.random.PRNGKey(0), (3, 5, 7, 7), dtype=jnp.float32)
    out4 = jax.block_until_ready(global_max_pool2d(y, p=1.0))
    ref4 = _reference(y, 1.0)
    assert out4.shape == (3, 5, 1, 1), out4.shape
    assert jnp.allclose(out4, ref4, atol=1e-6, rtol=1e-6), "mismatch vs reference (7x7)"

    print("KERNEL_OK")
</pallas_src>

<mosaic_0001>
module attributes {stable_mosaic.version = 11 : i64} {
  func.func @_gmp_single_pass_kernel(%arg0: i32, %arg1: memref<8x256xf32, #tpu.memory_space<vmem>>, %arg2: memref<1x1x8xf32, #tpu.memory_space<vmem>>) attributes {dimension_semantics = [#tpu.dimension_semantics<parallel>], iteration_bounds = array<i64: 1>, scalar_prefetch = 0 : i64, scratch_operands = 0 : i64, tpu.core_type = #tpu.core_type<tc>, window_params = [{transform_indices = @transform_0, window_bounds = array<i64: 8, 256>}, {transform_indices = @transform_1, window_bounds = array<i64: 1, 1, 8>}]} {
    %c0 = arith.constant 0 : index
    %c0_0 = arith.constant 0 : index
    %0 = vector.load %arg1[%c0, %c0_0] : memref<8x256xf32, #tpu.memory_space<vmem>>, vector<8x256xf32>
    %cst = arith.constant dense<0xFF800000> : vector<8xf32>
    %1 = vector.multi_reduction <maximumf>, %0, %cst [1] : vector<8x256xf32> to vector<8xf32>
    %2 = vector.shape_cast %1 : vector<8xf32> to vector<1x1x8xf32>
    %c0_1 = arith.constant 0 : index
    %c0_2 = arith.constant 0 : index
    %c0_3 = arith.constant 0 : index
    %3 = vector.load %arg2[%c0_1, %c0_2, %c0_3] : memref<1x1x8xf32, #tpu.memory_space<vmem>>, vector<1x1x8xf32>
    tpu.vector_store %arg2[%c0_1, %c0_2, %c0_3], %2 {strides = array<i32>} : memref<1x1x8xf32, #tpu.memory_space<vmem>>, vector<1x1x8xf32>,
    return
  }
  func.func @transform_0(%arg0: i32) -> (i32, i32) {
    %c0_i32 = arith.constant 0 : i32
    %c0_i32_0 = arith.constant 0 : i32
    return %arg0, %c0_i32 : i32, i32
  }
  func.func @transform_1(%arg0: i32) -> (i32, i32, i32) {
    %c0_i32 = arith.constant 0 : i32
    %c0_i32_0 = arith.constant 0 : i32
    %c0_i32_1 = arith.constant 0 : i32
    return %arg0, %c0_i32, %c0_i32_0 : i32, i32, i32
  }
}

</mosaic_0001>

<bundles_post_ra>
// kernel: tpu_custom_call.1
= control target key start
LH: loop header
LB: loop body
LE: loop exit
PB: predicated region body
PF: predicated region fallthrough
CT: control target
= control target key end

     0   :  { %6 = vsyncpa [#allocation3], 0  ;;  %s137_s0 = inlined_call_operand.hbm [shape: f32[8,256], index: 0, kind: input, shape index: {}]   ;;  %s138_s1 = inlined_call_operand.hbm [shape: f32[1,1,8], index: 1, kind: output, shape index: {}]  }
   0x1   :  { %7 = vsyncpa [#allocation4], 0  ;;  %s101_s6 = smov [#allocation2]   ;;  %s53_s10 = scalar_lea.hbm %s137_s0, 256 }
   0x2   :  { %s14_s7 = sshll.u32 %s101_s6, 4  ;;  %p54_p0 = scmp.ne.s32.totalorder %s137_s0, %s53_s10  ;;  %s15_s7 = int_to_ptr.vmem [resolvable:$true] %s14_s7 }
   0x3   :  { %p57_p1 = scmp.lt.u32.totalorder %s53_s10, %s137_s0 }
   0x5   :  { %p59_p2 = pnand %p57_p1, %p54_p0 }
   0x7   :  { %62 = shalt.err (!%p59_p2)
}
   0x8   :  { %s63_s15 = scalar_lea.vmem %s15_s7, 256  ;;  %p68_p4 = scmp.lt.s32.totalorder %s15_s7, %s15_s7 }
   0x9   :  { %p64_p3 = scmp.ne.s32.totalorder %s15_s7, %s63_s15  ;;  %p69_p5 = scmp.lt.s32.totalorder %s63_s15, %s63_s15 }
   0xb   :  { %p70_p6 = por %p69_p5, %p68_p4 }
   0xd   :  { %p71_p7 = pnand %p70_p6, %p64_p3 }
   0xf   :  { %74 = shalt.err (!%p71_p7)
}
  0x10   :  { %17 = dma.hbm_to_vmem [thread:$0]  %s137_s0, 256, %s15_s7, [#allocation3]  }
  0x11   :  { %97 = dma.done.wait [#allocation3], 256  }
  0x12   :  { %98 = vsyncadd [#allocation3], 4294967040  ;;  %v21_v0 = vld [vmem:[#allocation2] sm:$0xff]  ;;  %v22_v1 = vld [vmem:[#allocation2 + $0x8] sm:$0xff]  ;;  %v27_v3 = vlaneseq  ;;  %s102_s18 = smov [#allocation5]   ;;  %vm34_vm0 = vcmask 57344  }
  0x13   :  { %v23_v2 = vmax.f32 %v21_v0, %v22_v1  ;;  %s42_s19 = sshll.u32 %s102_s18, 4  ;;  %s43_s19 = int_to_ptr.vmem [resolvable:$true] %s42_s19 }
  0x14   :  { %v28_v4 = vand.u32 127, %v27_v3  ;;  %v30_v5 = vshrl.u32 %v27_v3, 7  ;;  %s75_s20 = scalar_lea.vmem %s43_s19, 16  ;;  %s79_s0 = scalar_lea.vmem %s43_s19, 32 }
  0x15   :  { %24 = vmax.xlane.f32.xlu0 %v23_v2  ;;  %p76_p8 = scmp.ne.s32.totalorder %s43_s19, %s75_s20  ;;  %p80_p9 = scmp.lt.s32.totalorder %s43_s19, %s43_s19 }
  0x16   :  { %v31_v6 = vsub.s32 %v28_v4, %v30_v5  ;;  %p81_p10 = scmp.lt.s32.totalorder %s79_s0, %s75_s20 }
  0x18   :  { %p82_p11 = por %p81_p10, %p80_p9 }
  0x1a   :  { %p83_p12 = pnand %p82_p11, %p76_p8 }
  0xa2   :  { %v25_v7 = vpop.xlane.xlu0 %24 }
  0xa3   :  { %v32_v8 = vrot.slane %v25_v7, %v31_v6 }
  0xa5   :  { %35 = vst.msk [vmem:[#allocation5] sm:$0x1] %vm34_vm0, %v32_v8 }
  0xa6   :  { %86 = shalt.err (!%p83_p12)
}
  0xa7   :  { %s87_s23 = scalar_lea.hbm %s138_s1, 16 }
  0xa8   :  { %p88_p13 = scmp.ne.s32.totalorder %s138_s1, %s87_s23  ;;  %p91_p0 = scmp.lt.u32.totalorder %s87_s23, %s138_s1 }
  0xaa   :  { %p93_p1 = pnand %p91_p0, %p88_p13 }
  0xac   :  { %96 = shalt.err (!%p93_p1)
}
  0xad   :  { %45 = dma.vmem_to_hbm [thread:$0]  %s43_s19, 16, %s138_s1, [#allocation4]  }
  0xae   :  { %99 = dma.done.wait [#allocation4], 16  }
  0xaf   :  { %100 = vsyncadd [#allocation4], 4294967280 }
  0xb0   :  { %49 = vsyncpa [#allocation3], 1 }
  0xb1   :  { %50 = vsyncpa [#allocation4], 1 }

</bundles_post_ra>
